<compile_context>
chip_gen: v5e
topology: v5e:2x2
jax: 0.10.0
libtpu: 0.0.40
codegen_flags: <defaults>
</compile_context>

<pallas_src>
import jax
import jax.numpy as jnp
from jax.experimental import pallas as pl
from jax.experimental.pallas import tpu as pltpu

import math

# ----------------------------- hyper-params ---------------------------------
EMBED = 32
HEADS = 4
HEAD_DIM = EMBED // HEADS
SEQ = 8
BATCH = 2


# ------------------------------- kernel -------------------------------------
def self_attention_kernel(v_ref, wfc_ref, bfc_ref, out_ref):
    # v:   (N, S, E)   values (heads folded back into E; module never projects them)
    # wfc: (E, E)      fc_out weight, pre-transposed to [in, out]
    # bfc: (1, E)      fc_out bias
    # out: (N, S, E)
    n, s, e = v_ref.shape

    # out[n,q,:] = fc_out( sum_v values[n,v,:] ), independent of q (see header).
    # Per-batch sum over the sequence axis: sublane (XLU) reduction, keeps the
    # single MXU matmul below as the only result-FIFO user.
    vsum = jnp.sum(v_ref[...], axis=1)                                 # (N, E)

    out_small = jnp.dot(vsum, wfc_ref[...],
                        preferred_element_type=jnp.float32)            # (N, E)
    out_small = out_small + bfc_ref[...]

    # Broadcast over the query positions and store one contiguous slab.
    out = jnp.broadcast_to(out_small[:, None, :], (n, s, e))
    out_ref[...] = out.astype(out_ref.dtype)


# ------------------------------- wrapper -------------------------------------
def self_attention(q, k, v, mask, w_fc, b_fc, *, heads=HEADS):
    """Same signature as the torch module's forward.

    q/k/v: (N, S, E); mask: (N, S, S) broadcast over heads (0 == masked).
    w_fc pre-transposed to [in, out]; b_fc: (1, E).

    q, k and mask cannot affect the result of this module's forward pass
    (the output einsum contracts the softmax to its row-sum, which is 1),
    so they are accepted for API parity and not shipped to the kernel.
    """
    del q, k, mask, heads  # mathematically irrelevant — see module analysis.
    N, S, E = v.shape

    vmem = pl.BlockSpec(memory_space=pltpu.MemorySpace.VMEM)
    out = pl.pallas_call(
        self_attention_kernel,
        out_shape=jax.ShapeDtypeStruct((N, S, E), jnp.float32),
        in_specs=[vmem, vmem, vmem],
        out_specs=vmem,
    )(v, w_fc, b_fc)
    return out


# --------------------------- pure-JAX reference -------------------------------
def reference(q, k, v, mask, w_fc, b_fc):
    """Literal transcription of the torch module's forward (softmax included)."""
    N, S, E = q.shape
    H, D = HEADS, E // HEADS
    qh = q.reshape(N, S, H, D)
    kh = k.reshape(N, S, H, D)
    vh = v.reshape(N, S, H, D)
    corr = jnp.einsum('nqhd,nkhd->nhqk', qh, kh)
    corr = jnp.where(mask[:, None, :, :] == 0, -1e20, corr)
    attn = jax.nn.softmax(corr / math.sqrt(E), axis=3)
    out = jnp.einsum('nhqk,nvhd->nqhd', attn, vh).reshape(N, S, E)
    return out @ w_fc + b_fc


# --------------------------------- main ---------------------------------------
if __name__ == "__main__":
    key = jax.random.PRNGKey(0)
    ks = jax.random.split(key, 5)

    q = jax.random.normal(ks[0], (BATCH, SEQ, EMBED), jnp.float32)
    k = jax.random.normal(ks[1], (BATCH, SEQ, EMBED), jnp.float32)
    v = jax.random.normal(ks[2], (BATCH, SEQ, EMBED), jnp.float32)

    # Causal mask (broadcast over heads); mask==0 means masked out.
    causal = jnp.tril(jnp.ones((SEQ, SEQ), jnp.float32))
    mask = jnp.broadcast_to(causal, (BATCH, SEQ, SEQ))

    # fc_out parameters (PyTorch stores weight as [out, in]; we pass [in, out]).
    w_fc = 0.1 * jax.random.normal(ks[3], (EMBED, EMBED), jnp.float32)
    b_fc = 0.1 * jax.random.normal(ks[4], (1, EMBED), jnp.float32)

    out = self_attention(q, k, v, mask, w_fc, b_fc)
    out = jax.block_until_ready(out)

    ref = reference(q, k, v, mask, w_fc, b_fc)
    assert out.shape == (BATCH, SEQ, EMBED)
    assert jnp.allclose(out, ref, atol=1e-4, rtol=1e-4), \
        f"max abs err {jnp.max(jnp.abs(out - ref))}"

    print("KERNEL_OK")
</pallas_src>

<mosaic_0001>
module attributes {stable_mosaic.version = 11 : i64} {
  func.func @self_attention_kernel(%arg0: memref<2x8x32xf32, #tpu.memory_space<vmem>>, %arg1: memref<32x32xf32, #tpu.memory_space<vmem>>, %arg2: memref<1x32xf32, #tpu.memory_space<vmem>>, %arg3: memref<2x8x32xf32, #tpu.memory_space<vmem>>) attributes {dimension_semantics = [], scalar_prefetch = 0 : i64, scratch_operands = 0 : i64, tpu.core_type = #tpu.core_type<tc>} {
    %c0 = arith.constant 0 : index
    %c0_0 = arith.constant 0 : index
    %c0_1 = arith.constant 0 : index
    %0 = vector.load %arg0[%c0, %c0_0, %c0_1] : memref<2x8x32xf32, #tpu.memory_space<vmem>>, vector<2x8x32xf32>
    %cst = arith.constant dense<0.000000e+00> : vector<2x32xf32>
    %1 = vector.multi_reduction <add>, %0, %cst [1] : vector<2x8x32xf32> to vector<2x32xf32>
    %c0_2 = arith.constant 0 : index
    %c0_3 = arith.constant 0 : index
    %2 = vector.load %arg1[%c0_2, %c0_3] : memref<32x32xf32, #tpu.memory_space<vmem>>, vector<32x32xf32>
    %cst_4 = arith.constant dense<0.000000e+00> : vector<2x32xf32>
    %3 = tpu.matmul %1, %2, %cst_4 {dimension_numbers = #tpu.dot_dimension_numbers<[1], [0], [0], [1], [0, 0, 1, 1], [], []>} : vector<2x32xf32>, vector<32x32xf32>, vector<2x32xf32> -> vector<2x32xf32>
    %c0_5 = arith.constant 0 : index
    %c0_6 = arith.constant 0 : index
    %4 = vector.load %arg2[%c0_5, %c0_6] : memref<1x32xf32, #tpu.memory_space<vmem>>, vector<1x32xf32>
    %5 = vector.broadcast %4 : vector<1x32xf32> to vector<2x32xf32>
    %6 = arith.addf %3, %5 : vector<2x32xf32>
    %7 = vector.shape_cast %6 : vector<2x32xf32> to vector<2x1x32xf32>
    %8 = vector.shape_cast %7 : vector<2x1x32xf32> to vector<2x1x32xf32>
    %9 = vector.broadcast %8 : vector<2x1x32xf32> to vector<2x8x32xf32>
    %c0_7 = arith.constant 0 : index
    %c0_8 = arith.constant 0 : index
    %c0_9 = arith.constant 0 : index
    %10 = vector.load %arg3[%c0_7, %c0_8, %c0_9] : memref<2x8x32xf32, #tpu.memory_space<vmem>>, vector<2x8x32xf32>
    tpu.vector_store %arg3[%c0_7, %c0_8, %c0_9], %9 {strides = array<i32>} : memref<2x8x32xf32, #tpu.memory_space<vmem>>, vector<2x8x32xf32>,
    return
  }
}

</mosaic_0001>

<bundles_post_ra>
// kernel: tpu_custom_call.1
= control target key start
LH: loop header
LB: loop body
LE: loop exit
PB: predicated region body
PF: predicated region fallthrough
CT: control target
= control target key end

     0   :  { %8 = vsyncpa [#allocation3], 0  ;;  %s262_s0 = inlined_call_operand.hbm [shape: f32[2,8,32], index: 0, kind: input, shape index: {}]   ;;  %s263_s1 = inlined_call_operand.hbm [shape: f32[32,32], index: 1, kind: input, shape index: {}]   ;;  %s264_s2 = inlined_call_operand.vmem [shape: f32[1,32], index: 2, kind: input, shape index: {}]   ;;  %s265_s3 = inlined_call_operand.hbm [shape: f32[2,8,32], index: 3, kind: output, shape index: {}]  }
   0x1   :  { %9 = vsyncpa [#allocation6], 0 }
   0x2   :  { %10 = vsyncpa [#allocation4], 0  ;;  %s15_s14 = sshll.u32 %s262_s0, 4  ;;  %s211_s15 = smov [#allocation2]   ;;  %s16_s14 = int_to_ptr.hbm [resolvable:$true] %s15_s14 }
   0x3   :  { %s17_s16 = sshll.u32 %s211_s15, 4  ;;  %s28_s19 = sshll.u32 %s263_s1, 4  ;;  %s18_s16 = int_to_ptr.vmem [resolvable:$true] %s17_s16  ;;  %s29_s19 = int_to_ptr.hbm [resolvable:$true] %s28_s19 }
   0x4   :  { %s212_s20 = smov 128   ;;  %s213_s21 = smov 8  }
   0x5   :  { %23 = dma.hbm_to_vmem [thread:$0]  %s16_s14, 256, %s18_s16, [#allocation3], %s212_s20, %s212_s20, %s213_s21  }
   0x6   :  { %s214_s22 = smov [#allocation5]  }
   0x7   :  { %s30_s23 = sshll.u32 %s214_s22, 4  ;;  %s31_s23 = int_to_ptr.vmem [resolvable:$true] %s30_s23 }
   0x8   :  { %36 = dma.hbm_to_vmem [thread:$0]  %s29_s19, 512, %s31_s23, [#allocation6], %s212_s20, %s212_s20, %s213_s21  }
   0x9   :  { %205 = dma.done.wait [#allocation3], 256  }
   0xa   :  { %206 = vsyncadd [#allocation3], 4294967040 }
   0xb   :  { %207 = dma.done.wait [#allocation6], 512  }
   0xc   :  { %208 = vsyncadd [#allocation6], 4294966784  ;;  %vm49_vm0 = vcmask 261120   ;;  %v67_v0 = vld [vmem:[#allocation5 + $0x18] sm:$0xff]  ;;  %v66_v1 = vld [vmem:[#allocation5 + $0x10] sm:$0xff]  ;;  %vm74_vm1 = vcmask 1041409  }
   0xd   :  { %90 = vmatpush.msra.mxu0 %v67_v0  ;;  %v47_v2 = vld [vmem:[#allocation2] sm:$0xff]  ;;  %v48_v3 = vld [vmem:[#allocation2 + $0x8] sm:$0xff]  ;;  %v65_v4 = vld [vmem:[#allocation5 + $0x8] sm:$0xff]  ;;  %s215_s24 = smov [#allocation7]   ;;  %s112_s28 = sshll.u32 %s265_s3, 4  ;;  %s113_s28 = int_to_ptr.hbm [resolvable:$true] %s112_s28 }
   0xe   :  { %v50_v5 = vsel %vm49_vm0, %v47_v2, 0.0  ;;  %v57_v6 = vsel %vm49_vm0, %v48_v3, 0.0  ;;  %v64_v9 = vld [vmem:[#allocation5] sm:$0xff]  ;;  %v132_v21 = vld [vmem:[%s264_s2] ss:$0 sm:$0xff]  ;;  %s110_s25 = sshll.u32 %s215_s24, 4  ;;  %s111_s25 = int_to_ptr.vmem [resolvable:$true] %s110_s25 }
   0xf   :  { %91 = vmatpush.msra.mxu0 %v66_v1  ;;  %v51_v7 = vrot.slane %v50_v5, 4  ;;  %v58_v8 = vrot.slane %v57_v6, 4 }
  0x11   :  { %92 = vmatpush.msra.mxu0 %v65_v4  ;;  %v52_v10 = vadd.f32 %v51_v7, %v50_v5  ;;  %v59_v11 = vadd.f32 %v58_v8, %v57_v6 }
  0x13   :  { %93 = vmatpush.msra.mxu0 %v64_v9  ;;  %v53_v12 = vrot.slane %v52_v10, 2  ;;  %v60_v13 = vrot.slane %v59_v11, 2 }
  0x15   :  { %v54_v14 = vadd.f32 %v53_v12, %v52_v10  ;;  %v61_v15 = vadd.f32 %v60_v13, %v59_v11 }
  0x17   :  { %v55_v16 = vrot.slane %v54_v14, 1  ;;  %v62_v17 = vrot.slane %v61_v15, 1 }
  0x19   :  { %v56_v18 = vadd.f32 %v55_v16, %v54_v14  ;;  %v63_v19 = vadd.f32 %v62_v17, %v61_v15 }
  0x1b   :  { %v75_v20 = vsel %vm74_vm1, %v63_v19, %v56_v18 }
  0x1c   :  { %126 = vmatmul.msk.f32.vlgmr.msra.gmra.mxu0 %vm49_vm0, %v75_v20 }
  0x99   :  { %v95_v22 = vpop.f32.mrf.mxu0 }
  0x9a   :  { %v96_v23 = vadd.f32 %v132_v21, %v95_v22 }
  0x9c   :  { %v99_v24 = vrot.slane %v96_v23, 1  ;;  %v100_v25 = vperm.slane %v96_v23, 0 }
  0x9e   :  { %v101_v26 = vperm.slane %v99_v24, 0  ;;  %104 = vst.msk [vmem:[#allocation7] sm:$0xff] %vm49_vm0, %v100_v25 }
  0xa0   :  { %105 = vst.msk [vmem:[#allocation7 + $0x8] sm:$0xff] %vm49_vm0, %v101_v26 }
  0xa1   :  { %118 = dma.vmem_to_hbm [thread:$0]  %s111_s25, 256, %s113_s28, [#allocation4], %s212_s20, %s212_s20, %s213_s21  }
  0xa2   :  { %209 = dma.done.wait [#allocation4], 256  }
  0xa3   :  { %210 = vsyncadd [#allocation4], 4294967040 }
  0xa4   :  { %123 = vsyncpa [#allocation3], 1 }
  0xa5   :  { %124 = vsyncpa [#allocation6], 1 }
  0xa6   :  { %125 = vsyncpa [#allocation4], 1 }

</bundles_post_ra>
